<compile_context>
chip_gen: v6e
topology: v6e:2x2x1
jax: 0.10.0
libtpu: 0.0.40
codegen_flags: <defaults>
</compile_context>

<pallas_src>
import functools

import jax
import jax.numpy as jnp
import numpy as np
from jax import lax
from jax.experimental import pallas as pl
from jax.experimental.pallas import tpu as pltpu


# ----------------------------------------------------------------------------
# Tiling / VMEM helpers
# ----------------------------------------------------------------------------
def _pick_tile(n, cap, align):
    """Largest tile <= cap that divides n and is a multiple of `align`; falls back to the
    full dimension (a block equal to the full array dim is always legal)."""
    if n <= cap:
        return n
    start = cap - (cap % align)
    for t in range(start, align - 1, -align):
        if n % t == 0:
            return t
    return n


def _pick_batch_tile(batch, cap=256, align=8):
    """Batch tile for the recurrence kernel: as large as possible (fills the 256-row MXU on
    v6e/v7x), multiple of 8, dividing the batch, and preferring >= 2 grid tiles so the
    'parallel' axis can be sharded across v7x's two TensorCores."""
    best_single = None
    t = min(cap, batch)
    t -= t % align
    while t >= align:
        if batch % t == 0:
            if batch // t >= 2:
                return t
            if best_single is None:
                best_single = t
        t -= align
    return best_single if best_single is not None else batch


def _vmem_bytes(shape, dtype):
    """Rough padded VMEM footprint (lane dim -> 128, sublane dim -> 8/16 by dtype)."""
    itemsize = np.dtype(dtype).itemsize
    dims = list(shape) if len(shape) >= 2 else [1] + list(shape or (1,))
    sub = max(8, 32 // itemsize)
    dims[-1] = -(-dims[-1] // 128) * 128
    dims[-2] = -(-dims[-2] // sub) * sub
    n = 1
    for d in dims:
        n *= d
    return n * itemsize


# ----------------------------------------------------------------------------
# Kernel 1: hoisted input projection  (S*B, E) @ (E, 4H) + bias  -> (S*B, 4H) in bf16
# ----------------------------------------------------------------------------
def input_proj_kernel(x_ref, w_ref, b_ref, o_ref):
    # bf16 MXU operands, f32 accumulation, f32 bias add, bf16 output.
    acc = jnp.dot(x_ref[...].astype(jnp.bfloat16), w_ref[...],
                  preferred_element_type=jnp.float32)
    o_ref[...] = (acc + b_ref[...]).astype(o_ref.dtype)


def run_input_proj(x2d, w_ih_t, b_gates):
    M, E = x2d.shape
    G = w_ih_t.shape[1]
    TM = _pick_tile(M, cap=512, align=8)
    TN = _pick_tile(G, cap=512, align=128)       # tile the 4H axis too (v5e VMEM headroom)

    vmem_est = (2 * _vmem_bytes((TM, E), jnp.float32)      # x tiles (double-buffered)
                + 2 * _vmem_bytes((E, TN), jnp.bfloat16)   # weight tiles
                + 2 * _vmem_bytes((1, TN), jnp.float32)    # bias tiles
                + 2 * _vmem_bytes((TM, TN), jnp.bfloat16)) # output tiles
    vmem_limit = int(min(2 * vmem_est + (8 << 20), 64 << 20))

    return pl.pallas_call(
        input_proj_kernel,
        out_shape=jax.ShapeDtypeStruct((M, G), jnp.bfloat16),
        grid_spec=pltpu.PrefetchScalarGridSpec(
            num_scalar_prefetch=0,
            grid=(M // TM, G // TN),
            in_specs=[
                pl.BlockSpec((TM, E), lambda i, j: (i, 0)),
                pl.BlockSpec((E, TN), lambda i, j: (0, j)),
                pl.BlockSpec((1, TN), lambda i, j: (0, j)),
            ],
            out_specs=pl.BlockSpec((TM, TN), lambda i, j: (i, j)),
        ),
        compiler_params=pltpu.CompilerParams(
            dimension_semantics=("parallel", "parallel"),
            vmem_limit_bytes=vmem_limit),
    )(x2d, w_ih_t, b_gates)


# ----------------------------------------------------------------------------
# Kernel 2: fused LSTM recurrence + attention over time + linear head.
#   - gates_x streamed from HBM per timestep (manual double-buffered DMA).
#   - recurrence state in f32 VMEM scratch, per-step hidden states in a bf16 slab.
#   - attention = single streaming online-softmax pass over the bf16 slab.
# ----------------------------------------------------------------------------
def lstm_attn_kernel(gx_hbm, whh_ref, wlab_ref, blab_ref, logits_ref,
                     gx_buf, gx_sem, h_sc, c_sc, lo_sc, m_sc, l_sc, acc_sc,
                     *, seq_len, hidden_size, batch_tile):
    H = hidden_size
    TB = batch_tile

    row0 = pl.program_id(0) * TB
    if TB % 8 == 0:
        row0 = pl.multiple_of(row0, 8)

    def gx_copy(t, slot):
        # (TB, 4H) bf16 slice of the (S, B, 4H) HBM array for this batch tile / timestep.
        return pltpu.make_async_copy(gx_hbm.at[t, pl.ds(row0, TB), :],
                                     gx_buf.at[slot], gx_sem.at[slot])

    # Prime slot 0 while initializing state.
    gx_copy(0, 0).start()
    h_sc[...] = jnp.zeros_like(h_sc)
    c_sc[...] = jnp.zeros_like(c_sc)

    def step(t, carry):
        slot = lax.rem(t, 2)
        gx_copy(t, slot).wait()

        @pl.when(t + 1 < seq_len)
        def _():
            gx_copy(t + 1, 1 - slot).start()

        # Critical path: recurrent matmul with bf16 operands, f32 accumulation.
        gates = gx_buf[slot].astype(jnp.float32) + jnp.dot(
            h_sc[...].astype(jnp.bfloat16), whh_ref[...],
            preferred_element_type=jnp.float32)                      # (TB, 4H) f32

        # Gate columns pre-reordered to [i, f, o, g]: one contiguous sigmoid, one tanh.
        ifo = jax.nn.sigmoid(gates[:, :3 * H])
        g_g = jnp.tanh(gates[:, 3 * H:])
        i_g = ifo[:, 0 * H:1 * H]
        f_g = ifo[:, 1 * H:2 * H]
        o_g = ifo[:, 2 * H:3 * H]
        c_new = f_g * c_sc[...] + i_g * g_g
        h_new = o_g * jnp.tanh(c_new)
        c_sc[...] = c_new
        h_sc[...] = h_new
        lo_sc[t] = h_new.astype(jnp.bfloat16)     # per-step hidden state stays in VMEM (bf16)
        return carry

    lax.fori_loop(0, seq_len, step, 0, unroll=2)

    # --- attention over time: streaming online softmax over the lo_sc slab ---------------
    h_n = h_sc[...]                               # (TB, H) f32: final hidden state

    m_sc[...] = jnp.full(m_sc.shape, -jnp.inf, dtype=m_sc.dtype)
    l_sc[...] = jnp.zeros_like(l_sc)
    acc_sc[...] = jnp.zeros_like(acc_sc)

    def attn_step(t, carry):
        lo_t = lo_sc[t].astype(jnp.float32)                         # (TB, H)
        s_t = jnp.sum(lo_t * h_n, axis=-1, keepdims=True)           # (TB, 1) scores
        m_new = jnp.maximum(m_sc[...], s_t)
        alpha = jnp.exp(m_sc[...] - m_new)
        p = jnp.exp(s_t - m_new)
        l_sc[...] = alpha * l_sc[...] + p
        acc_sc[...] = alpha * acc_sc[...] + p * lo_t
        m_sc[...] = m_new
        return carry

    lax.fori_loop(0, seq_len, attn_step, 0, unroll=2)

    new_h = acc_sc[...] * pl.reciprocal(l_sc[...], approx=True)     # (TB, H) f32

    # --- linear head (bf16 MXU operands, f32 accumulation) -------------------------------
    logits = jnp.dot(new_h.astype(jnp.bfloat16), wlab_ref[...],
                     preferred_element_type=jnp.float32) + blab_ref[...]
    logits_ref[...] = logits.astype(logits_ref.dtype)


def run_lstm_attention(gates_x, w_hh_t, w_label_t, b_label):
    S, B, G = gates_x.shape
    H = w_hh_t.shape[0]
    O = w_label_t.shape[1]
    TB = _pick_batch_tile(B)
    kernel = functools.partial(lstm_attn_kernel, seq_len=S, hidden_size=H, batch_tile=TB)

    vmem_est = (
        2 * _vmem_bytes((TB, G), jnp.bfloat16)          # gx double buffer
        + _vmem_bytes((S, TB, H), jnp.bfloat16)         # per-step hidden states
        + 3 * _vmem_bytes((TB, H), jnp.float32)         # h, c, acc
        + 2 * _vmem_bytes((TB, 1), jnp.float32)         # m, l
        + _vmem_bytes((H, G), jnp.bfloat16)             # W_hh^T (single-buffered)
        + _vmem_bytes((H, O), jnp.bfloat16)
        + _vmem_bytes((1, O), jnp.float32)
        + 2 * _vmem_bytes((TB, O), jnp.float32)         # logits output tiles
    )
    vmem_limit = int(min(2 * vmem_est + (8 << 20), 64 << 20))   # 64 MiB = v7x physical cap

    return pl.pallas_call(
        kernel,
        out_shape=jax.ShapeDtypeStruct((B, O), jnp.float32),
        grid_spec=pltpu.PrefetchScalarGridSpec(
            num_scalar_prefetch=0,
            grid=(B // TB,),
            in_specs=[
                pl.BlockSpec(memory_space=pl.ANY),                  # gates_x: streamed via DMA
                pl.BlockSpec(memory_space=pltpu.MemorySpace.VMEM),  # W_hh^T (whole, 1 copy)
                pl.BlockSpec(memory_space=pltpu.MemorySpace.VMEM),  # label weight
                pl.BlockSpec(memory_space=pltpu.MemorySpace.VMEM),  # label bias
            ],
            out_specs=pl.BlockSpec((TB, O), lambda b: (b, 0)),
            scratch_shapes=[
                pltpu.VMEM((2, TB, G), jnp.bfloat16),               # gx double buffer
                pltpu.SemaphoreType.DMA((2,)),                      # per-slot DMA sems
                pltpu.VMEM((TB, H), jnp.float32),                   # h_t
                pltpu.VMEM((TB, H), jnp.float32),                   # c_t
                pltpu.VMEM((S, TB, H), jnp.bfloat16),               # all per-step hidden states
                pltpu.VMEM((TB, 1), jnp.float32),                   # online-softmax max
                pltpu.VMEM((TB, 1), jnp.float32),                   # online-softmax denom
                pltpu.VMEM((TB, H), jnp.float32),                   # attention accumulator
            ],
        ),
        compiler_params=pltpu.CompilerParams(
            dimension_semantics=("parallel",),                      # batch tiles independent
            vmem_limit_bytes=vmem_limit),
    )(gates_x, w_hh_t, w_label_t, b_label)


# ----------------------------------------------------------------------------
# Full forward (Pallas) and a pure-JAX f32 reference for validation.
# ----------------------------------------------------------------------------
def prepare_pallas_params(params):
    """Reorder PyTorch gate blocks [i, f, g, o] -> [i, f, o, g], pre-transpose, and pre-cast
    the matmul weights to bf16 (one-time conversion off the hot path)."""
    H = params["w_hh"].shape[1]
    order = jnp.concatenate([jnp.arange(0, 2 * H),
                             jnp.arange(3 * H, 4 * H),
                             jnp.arange(2 * H, 3 * H)])
    w_ih = params["w_ih"][order]                         # (4H, E)
    w_hh = params["w_hh"][order]                         # (4H, H)
    b = (params["b_ih"] + params["b_hh"])[order]         # (4H,)
    return {
        "w_ih_t": jnp.transpose(w_ih).astype(jnp.bfloat16),          # (E, 4H)
        "w_hh_t": jnp.transpose(w_hh).astype(jnp.bfloat16),          # (H, 4H)
        "b_gates": b[None, :].astype(jnp.float32),                   # (1, 4H)
        "w_label_t": jnp.transpose(params["w_label"]).astype(jnp.bfloat16),  # (H, O)
        "b_label": params["b_label"][None, :].astype(jnp.float32),   # (1, O)
    }


def lstm_attention_forward(x, pp):
    S, B, E = x.shape
    H = pp["w_hh_t"].shape[0]
    # Hoisted input projection: one large parallel MXU matmul over all S*B rows (bf16 out).
    gates_x = run_input_proj(x.reshape(S * B, E), pp["w_ih_t"], pp["b_gates"])
    gates_x = gates_x.reshape(S, B, 4 * H)
    # Fused recurrence + attention + head; gates_x streamed from HBM per timestep.
    return run_lstm_attention(gates_x, pp["w_hh_t"], pp["w_label_t"], pp["b_label"])


def lstm_attention_reference(x, params):
    """Pure-JAX f32 mirror of the PyTorch module (standard [i, f, g, o] gate order)."""
    H = params["w_hh"].shape[1]
    B = x.shape[1]
    w_ih, w_hh = params["w_ih"], params["w_hh"]
    b = params["b_ih"] + params["b_hh"]

    def step(carry, x_t):
        h, c = carry
        gates = x_t @ w_ih.T + h @ w_hh.T + b
        i = jax.nn.sigmoid(gates[:, 0 * H:1 * H])
        f = jax.nn.sigmoid(gates[:, 1 * H:2 * H])
        g = jnp.tanh(gates[:, 2 * H:3 * H])
        o = jax.nn.sigmoid(gates[:, 3 * H:4 * H])
        c = f * c + i * g
        h = o * jnp.tanh(c)
        return (h, c), h

    init = (jnp.zeros((B, H), jnp.float32), jnp.zeros((B, H), jnp.float32))
    (h_n, _), ys = jax.lax.scan(step, init, x)            # ys: (S, B, H)
    lo = jnp.transpose(ys, (1, 0, 2))                     # output.permute(1, 0, 2)
    attn = jnp.einsum("bsh,bh->bs", lo, h_n)
    soft = jax.nn.softmax(attn, axis=1)
    new_h = jnp.einsum("bsh,bs->bh", lo, soft)
    return new_h @ params["w_label"].T + params["b_label"]


def init_params(key, embedding_length, hidden_size, output_size):
    ks = jax.random.split(key, 6)
    scale = 0.1
    H, E, O = hidden_size, embedding_length, output_size
    # PyTorch nn.LSTM / nn.Linear native layouts.
    return {
        "w_ih": scale * jax.random.normal(ks[0], (4 * H, E), jnp.float32),
        "w_hh": scale * jax.random.normal(ks[1], (4 * H, H), jnp.float32),
        "b_ih": scale * jax.random.normal(ks[2], (4 * H,), jnp.float32),
        "b_hh": scale * jax.random.normal(ks[3], (4 * H,), jnp.float32),
        "w_label": scale * jax.random.normal(ks[4], (O, H), jnp.float32),
        "b_label": scale * jax.random.normal(ks[5], (O,), jnp.float32),
    }


if __name__ == "__main__":
    seq_len, batch, embedding_length = 8, 2, 16
    hidden_size, output_size = 32, 4

    key = jax.random.PRNGKey(0)
    kx, kp = jax.random.split(key)
    x = jax.random.normal(kx, (seq_len, batch, embedding_length), jnp.float32)
    params = init_params(kp, embedding_length, hidden_size, output_size)
    pallas_params = prepare_pallas_params(params)

    logits = jax.block_until_ready(lstm_attention_forward(x, pallas_params))

    ref = jax.block_until_ready(lstm_attention_reference(x, params))
    # bf16 MXU operands / bf16 gates_x + hidden-state storage -> loosened tolerance.
    np.testing.assert_allclose(np.asarray(logits), np.asarray(ref), rtol=2e-2, atol=2e-2)
    assert logits.shape == (batch, output_size)
    print("KERNEL_OK")
</pallas_src>

<mosaic_0001>
module attributes {stable_mosaic.version = 11 : i64} {
  func.func @input_proj_kernel(%arg0: i32, %arg1: i32, %arg2: memref<16x16xf32, #tpu.memory_space<vmem>>, %arg3: memref<16x128xbf16, #tpu.memory_space<vmem>>, %arg4: memref<1x128xf32, #tpu.memory_space<vmem>>, %arg5: memref<16x128xbf16, #tpu.memory_space<vmem>>) attributes {dimension_semantics = [#tpu.dimension_semantics<parallel>, #tpu.dimension_semantics<parallel>], iteration_bounds = array<i64: 1, 1>, scalar_prefetch = 0 : i64, scratch_operands = 0 : i64, tpu.core_type = #tpu.core_type<tc>, window_params = [{transform_indices = @transform_0, window_bounds = array<i64: 16, 16>}, {transform_indices = @transform_1, window_bounds = array<i64: 16, 128>}, {transform_indices = @transform_2, window_bounds = array<i64: 1, 128>}, {transform_indices = @transform_3, window_bounds = array<i64: 16, 128>}]} {
    %c0 = arith.constant 0 : index
    %c0_0 = arith.constant 0 : index
    %0 = vector.load %arg2[%c0, %c0_0] : memref<16x16xf32, #tpu.memory_space<vmem>>, vector<16x16xf32>
    %1 = arith.truncf %0 : vector<16x16xf32> to vector<16x16xbf16>
    %c0_1 = arith.constant 0 : index
    %c0_2 = arith.constant 0 : index
    %2 = vector.load %arg3[%c0_1, %c0_2] : memref<16x128xbf16, #tpu.memory_space<vmem>>, vector<16x128xbf16>
    %cst = arith.constant dense<0.000000e+00> : vector<16x128xf32>
    %3 = tpu.matmul %1, %2, %cst {dimension_numbers = #tpu.dot_dimension_numbers<[1], [0], [0], [1], [0, 0, 1, 1], [], []>} : vector<16x16xbf16>, vector<16x128xbf16>, vector<16x128xf32> -> vector<16x128xf32>
    %c0_3 = arith.constant 0 : index
    %c0_4 = arith.constant 0 : index
    %4 = vector.load %arg4[%c0_3, %c0_4] : memref<1x128xf32, #tpu.memory_space<vmem>>, vector<1x128xf32>
    %5 = vector.broadcast %4 : vector<1x128xf32> to vector<16x128xf32>
    %6 = arith.addf %3, %5 : vector<16x128xf32>
    %7 = arith.truncf %6 : vector<16x128xf32> to vector<16x128xbf16>
    %c0_5 = arith.constant 0 : index
    %c0_6 = arith.constant 0 : index
    %8 = vector.load %arg5[%c0_5, %c0_6] : memref<16x128xbf16, #tpu.memory_space<vmem>>, vector<16x128xbf16>
    tpu.vector_store %arg5[%c0_5, %c0_6], %7 {strides = array<i32>} : memref<16x128xbf16, #tpu.memory_space<vmem>>, vector<16x128xbf16>,
    return
  }
  func.func @transform_0(%arg0: i32, %arg1: i32) -> (i32, i32) {
    %c0_i32 = arith.constant 0 : i32
    %c0_i32_0 = arith.constant 0 : i32
    return %arg0, %c0_i32 : i32, i32
  }
  func.func @transform_1(%arg0: i32, %arg1: i32) -> (i32, i32) {
    %c0_i32 = arith.constant 0 : i32
    %c0_i32_0 = arith.constant 0 : i32
    return %c0_i32, %arg1 : i32, i32
  }
  func.func @transform_2(%arg0: i32, %arg1: i32) -> (i32, i32) {
    %c0_i32 = arith.constant 0 : i32
    %c0_i32_0 = arith.constant 0 : i32
    return %c0_i32, %arg1 : i32, i32
  }
  func.func @transform_3(%arg0: i32, %arg1: i32) -> (i32, i32) {
    %c0_i32 = arith.constant 0 : i32
    return %arg0, %arg1 : i32, i32
  }
}

</mosaic_0001>

<bundles_post_ra>
// kernel: tpu_custom_call.1
= control target key start
LH: loop header
LB: loop body
LE: loop exit
PB: predicated region body
PF: predicated region fallthrough
CT: control target
= control target key end

     0   :  { %8 = vsyncpa [#allocation3], 0  ;;  %s278_s0 = inlined_call_operand.hbm [shape: f32[16,16], index: 0, kind: input, shape index: {}]   ;;  %s279_s1 = inlined_call_operand.hbm [shape: bf16[16,128], index: 1, kind: input, shape index: {}]   ;;  %s280_s2 = inlined_call_operand.vmem [shape: f32[1,128], index: 2, kind: input, shape index: {}]   ;;  %s281_s3 = inlined_call_operand.hbm [shape: bf16[16,128], index: 3, kind: output, shape index: {}]  }
   0x1   :  { %9 = vsyncpa [#allocation6], 0 }
   0x2   :  { %10 = vsyncpa [#allocation4], 0  ;;  %s231_s12 = smov [#allocation2]  }
   0x3   :  { %s16_s13 = sshll.u32 %s231_s12, 4  ;;  %s17_s13 = int_to_ptr.vmem [resolvable:$true] %s16_s13 }
   0x4   :  { %s173_s14 = scalar_lea.vmem %s17_s13, 256  ;;  %p178_p1 = scmp.lt.s32.totalorder %s17_s13, %s17_s13 }
   0x5   :  { %p174_p0 = scmp.ne.s32.totalorder %s17_s13, %s173_s14  ;;  %p179_p2 = scmp.lt.s32.totalorder %s173_s14, %s173_s14 }
   0x7   :  { %p180_p3 = por %p179_p2, %p178_p1 }
   0x9   :  { %p181_p4 = pnand %p180_p3, %p174_p0 }
   0xb   :  { %184 = shalt.err (!%p181_p4)
}
   0xc   :  { %s232_s15 = smov 128   ;;  %s233_s16 = smov 8  }
   0xd   :  { %22 = dma.hbm_to_vmem [thread:$0]  %s278_s0, 256, %s17_s13, [#allocation3], %s232_s15, %s232_s15, %s233_s16  }
   0xe   :  { %s234_s19 = smov [#allocation5]  }
   0xf   :  { %s28_s20 = sshll.u32 %s234_s19, 4  ;;  %s29_s20 = int_to_ptr.vmem [resolvable:$true] %s28_s20 }
  0x10   :  { %s193_s21 = scalar_lea.vmem %s29_s20, 128  ;;  %p198_p6 = scmp.lt.s32.totalorder %s29_s20, %s29_s20 }
  0x11   :  { %p194_p5 = scmp.ne.s32.totalorder %s29_s20, %s193_s21  ;;  %p199_p7 = scmp.lt.s32.totalorder %s193_s21, %s193_s21 }
  0x13   :  { %p200_p8 = por %p199_p7, %p198_p6 }
  0x15   :  { %p201_p9 = pnand %p200_p8, %p194_p5 }
  0x17   :  { %204 = shalt.err (!%p201_p9)
}
  0x18   :  { %s235_s22 = smov 64   ;;  %s236_s23 = smov 4  }
  0x19   :  { %34 = dma.hbm_to_vmem [thread:$0]  %s279_s1, 128, %s29_s20, [#allocation6], %s235_s22, %s235_s22, %s236_s23  }
  0x1a   :  { %225 = dma.done.wait [#allocation3], 256  }
  0x1b   :  { %226 = vsyncadd [#allocation3], 4294967040 }
  0x1c   :  { %227 = dma.done.wait [#allocation6], 128  }
  0x1d   :  { %228 = vsyncadd [#allocation6], 4294967168  ;;  %v237_v0 = vmov 0.0   ;;  %vm238_vm0 = vmmov 0   ;;  %v164_v1 = vld [vmem:[#allocation5] sm:$0xff]   ;;  %v44_v2 = vld [vmem:[#allocation2] sm:$0xff] }
  0x1e   :  { %149 = vmatprep.subr.bf16.mxu0 %v237_v0  ;;  %151 = vmatprep.mubr.msk.bf16.mxu0 %vm238_vm0, %v237_v0  ;;  %v45_v3 = vld [vmem:[#allocation2 + $0x8] sm:$0xff]  ;;  %vm62_vm1 = vcmask 130048   ;;  %v135_v6 = vld [vmem:[%s280_s2] ss:$0 sm:$0xff]  ;;  %s239_s1 = smov [#allocation7]  }
  0x1f   :  { %150 = vmatpush3.bf16.msra.mxu0 %v164_v1  ;;  %v46_v4 = vpack.c.bf16 %v45_v3, %v44_v2  ;;  %s122_s27 = sshll.u32 %s239_s1, 4  ;;  %s123_s27 = int_to_ptr.vmem [resolvable:$true] %s122_s27 }
  0x20   :  { %s205_s28 = scalar_lea.vmem %s123_s27, 128  ;;  %p210_p11 = scmp.lt.s32.totalorder %s123_s27, %s123_s27 }
  0x21   :  { %p206_p10 = scmp.ne.s32.totalorder %s123_s27, %s205_s28  ;;  %p211_p12 = scmp.lt.s32.totalorder %s205_s28, %s205_s28 }
  0x22   :  { %152 = vmatmul.mubr.msk.bf16.vlgmr.msra.gmra.mxu0 %vm62_vm1, %v46_v4 }
  0x23   :  { %p212_p13 = por %p211_p12, %p210_p11 }
  0x25   :  { %p213_p0 = pnand %p212_p13, %p206_p10 }
  0xe2   :  { %v100_v5 = vpop.f32.mrf.mxu0 }
  0xe3   :  { %v101_v9 = vadd.f32 %v135_v6, %v100_v5 }
  0xe4   :  { %v153_v7 = vpop.f32.mrf.mxu0 }
  0xe6   :  { %v103_v8 = vpop.f32.mrf.mxu0 }
  0xe7   :  { %v104_v10 = vadd.f32 %v135_v6, %v103_v8 }
  0xe8   :  { %v154_v11 = vpop.f32.mrf.mxu0 }
  0xe9   :  { %v145_v12 = vpack.c.bf16 %v104_v10, %v101_v9 }
  0xeb   :  { %146 = vst [vmem:[#allocation7] sm:$0xff] %v145_v12  }
  0xec   :  { %216 = shalt.err (!%p213_p0)
}
  0xed   :  { %128 = dma.vmem_to_hbm [thread:$0]  %s123_s27, 128, %s281_s3, [#allocation4], %s235_s22, %s235_s22, %s236_s23  }
  0xee   :  { %229 = dma.done.wait [#allocation4], 128  }
  0xef   :  { %230 = vsyncadd [#allocation4], 4294967168 }
  0xf0   :  { %132 = vsyncpa [#allocation3], 1 }
  0xf1   :  { %133 = vsyncpa [#allocation6], 1 }
  0xf2   :  { %134 = vsyncpa [#allocation4], 1 }

</bundles_post_ra>
